<compile_context>
chip_gen: v6e
topology: v6e:2x2x1
jax: 0.10.0
libtpu: 0.0.40
codegen_flags: <defaults>
</compile_context>

<pallas_src>
import numpy as np
import jax
import jax.numpy as jnp
from jax import lax
from jax.experimental import pallas as pl
from jax.experimental.pallas import tpu as pltpu


# ------------------------------ Pallas kernel -------------------------------

def _fused_forward_kernel(
    x_ref, attn_old_ref, attn_new_ref, masks_ref, logits_ref,
    wc1_ref, bc1_ref, wc2_ref, bc2_ref,
    wa1_ref, ba1_ref, wa2_ref, ba2_ref,
    wv_ref, bv_ref,
    value_ref, actor_ref, logp_ref, attn_out_ref,
):
    # attn_masks = new * (1 - masks) + old * masks
    masks = masks_ref[...]                               # (B, 1)
    attn = attn_new_ref[...] * (1.0 - masks) + attn_old_ref[...] * masks  # (B, D)
    attn_out_ref[...] = attn

    # Bernoulli(probs=sigmoid(a)).log_prob(attn) = attn * a - softplus(a)
    a = logits_ref[...]                                  # (1, D) input_attention
    softplus_a = jnp.maximum(a, 0.0) + jnp.log(1.0 + jnp.exp(-jnp.abs(a)))
    logp_ref[...] = jnp.sum(attn * a - softplus_a, axis=1, keepdims=True)

    # masked observations
    x = attn * x_ref[...]                                # (B, D)

    # critic: Linear -> tanh -> Linear -> tanh -> Linear(1)
    hc = jnp.tanh(jnp.dot(x, wc1_ref[...], preferred_element_type=jnp.float32)
                  + bc1_ref[...])
    hc = jnp.tanh(jnp.dot(hc, wc2_ref[...], preferred_element_type=jnp.float32)
                  + bc2_ref[...])
    # critic_linear weight stored as (1, H) row -> lane mul + reduce (avoids N=1 matmul)
    value_ref[...] = jnp.sum(hc * wv_ref[...], axis=1, keepdims=True) + bv_ref[...]

    # actor: Linear -> tanh -> Linear -> tanh
    ha = jnp.tanh(jnp.dot(x, wa1_ref[...], preferred_element_type=jnp.float32)
                  + ba1_ref[...])
    ha = jnp.tanh(jnp.dot(ha, wa2_ref[...], preferred_element_type=jnp.float32)
                  + ba2_ref[...])
    actor_ref[...] = ha


# ------------------------------- wrappers ------------------------------------

def _forward_fused(params, inputs, masks, attn_masks, new_attn_masks):
    b, d = inputs.shape
    h = params["wc1"].shape[1]
    vmem = pl.BlockSpec(memory_space=pltpu.MemorySpace.VMEM)
    out_shape = (
        jax.ShapeDtypeStruct((b, 1), jnp.float32),   # critic value
        jax.ShapeDtypeStruct((b, h), jnp.float32),   # hidden_actor
        jax.ShapeDtypeStruct((b, 1), jnp.float32),   # attn_log_probs
        jax.ShapeDtypeStruct((b, d), jnp.float32),   # attn_masks
    )
    return pl.pallas_call(
        _fused_forward_kernel,
        out_shape=out_shape,
        in_specs=[vmem] * 15,
        out_specs=(vmem, vmem, vmem, vmem),
    )(inputs, attn_masks, new_attn_masks, masks, params["input_attention"],
      params["wc1"], params["bc1"], params["wc2"], params["bc2"],
      params["wa1"], params["ba1"], params["wa2"], params["ba2"],
      params["wv"], params["bv"])


def sample_attn_masks(params, key, batch):
    """probs.sample() of the module: Bernoulli(sigmoid(input_attention))."""
    probs = jax.nn.sigmoid(params["input_attention"])            # (1, D)
    d = probs.shape[1]
    return jax.random.bernoulli(key, probs, (batch, d)).astype(jnp.float32)


def mlp_hard_attn_forward(params, inputs, rnn_hxs, masks, attn_masks,
                          reuse_masks=False, key=None):
    """Mirrors MLPHardAttnReinforceBase.forward with recurrent=False."""
    if reuse_masks:
        new_attn_masks = attn_masks
    else:
        if key is None:
            raise ValueError("key is required when reuse_masks=False")
        new_attn_masks = sample_attn_masks(params, key, inputs.shape[0])
    value, hidden_actor, attn_log_probs, attn_out = _forward_fused(
        params, inputs, masks, attn_masks, new_attn_masks)
    # TODO(synk): recurrent GRU path (self._forward_gru) not implemented; module
    # default is recurrent=False so rnn_hxs is returned unchanged.
    return value, hidden_actor, rnn_hxs, attn_log_probs, attn_out


# --------------------------- parameter init ----------------------------------

def _orthogonal(key, shape, gain):
    rows, cols = shape
    a = jax.random.normal(key, (max(rows, cols), min(rows, cols)), jnp.float32)
    q, r = jnp.linalg.qr(a)
    q = q * jnp.sign(jnp.diagonal(r))
    if rows < cols:
        q = q.T
    return (gain * q[:rows, :cols]).astype(jnp.float32)


def make_params(key, num_inputs, hidden_size):
    ks = jax.random.split(key, 5)
    gain = float(np.sqrt(2.0))
    zeros_h = jnp.zeros((1, hidden_size), jnp.float32)
    return {
        # nn.Parameter(torch.ones(num_obs_input)) -> Bernoulli logits
        "input_attention": jnp.ones((1, num_inputs), jnp.float32),
        # Linear weights stored (in_features, out_features) so the kernel does x @ W
        "wc1": _orthogonal(ks[0], (num_inputs, hidden_size), gain),
        "bc1": zeros_h,
        "wc2": _orthogonal(ks[1], (hidden_size, hidden_size), gain),
        "bc2": zeros_h,
        "wa1": _orthogonal(ks[2], (num_inputs, hidden_size), gain),
        "ba1": zeros_h,
        "wa2": _orthogonal(ks[3], (hidden_size, hidden_size), gain),
        "ba2": zeros_h,
        # critic_linear weight kept as a (1, H) row vector
        "wv": _orthogonal(ks[4], (1, hidden_size), gain),
        "bv": jnp.zeros((1, 1), jnp.float32),
    }


# ------------------------- pure-JAX reference ---------------------------------

def _ref_forward(params, inputs, masks, attn_masks, new_attn_masks):
    hi = lax.Precision.HIGHEST
    a = params["input_attention"]
    attn = new_attn_masks * (1.0 - masks) + attn_masks * masks
    softplus_a = jnp.maximum(a, 0.0) + jnp.log(1.0 + jnp.exp(-jnp.abs(a)))
    logp = jnp.sum(attn * a - softplus_a, axis=1, keepdims=True)
    x = attn * inputs
    hc = jnp.tanh(jnp.dot(x, params["wc1"], precision=hi) + params["bc1"])
    hc = jnp.tanh(jnp.dot(hc, params["wc2"], precision=hi) + params["bc2"])
    value = jnp.sum(hc * params["wv"], axis=1, keepdims=True) + params["bv"]
    ha = jnp.tanh(jnp.dot(x, params["wa1"], precision=hi) + params["ba1"])
    ha = jnp.tanh(jnp.dot(ha, params["wa2"], precision=hi) + params["ba2"])
    return value, ha, logp, attn


# --------------------------------- main ----------------------------------------

if __name__ == "__main__":
    key = jax.random.PRNGKey(0)
    kp, kx, km, ka, ks = jax.random.split(key, 5)

    batch, num_inputs, hidden_size = 8, 16, 64
    params = make_params(kp, num_inputs, hidden_size)

    inputs = jax.random.normal(kx, (batch, num_inputs), jnp.float32)
    masks = (jax.random.uniform(km, (batch, 1)) > 0.5).astype(jnp.float32)
    attn_masks = jax.random.bernoulli(ka, 0.5, (batch, num_inputs)).astype(jnp.float32)
    rnn_hxs = jnp.zeros((batch, 1), jnp.float32)

    # --- path 1: reuse_masks=True (no sampling, fully deterministic) ---
    value, actor, hxs, logp, attn_out = mlp_hard_attn_forward(
        params, inputs, rnn_hxs, masks, attn_masks, reuse_masks=True)
    jax.block_until_ready((value, actor, logp, attn_out))
    rv, ra, rl, ratt = _ref_forward(params, inputs, masks, attn_masks, attn_masks)
    np.testing.assert_allclose(np.asarray(value), np.asarray(rv), rtol=1e-4, atol=1e-4)
    np.testing.assert_allclose(np.asarray(actor), np.asarray(ra), rtol=1e-4, atol=1e-4)
    np.testing.assert_allclose(np.asarray(logp), np.asarray(rl), rtol=1e-4, atol=1e-4)
    np.testing.assert_allclose(np.asarray(attn_out), np.asarray(ratt), rtol=0, atol=0)

    # --- path 2: fresh Bernoulli mask sample (deterministic via explicit key) ---
    value2, actor2, hxs2, logp2, attn_out2 = mlp_hard_attn_forward(
        params, inputs, rnn_hxs, masks, attn_masks, reuse_masks=False, key=ks)
    jax.block_until_ready((value2, actor2, logp2, attn_out2))
    new_masks = sample_attn_masks(params, ks, batch)
    rv2, ra2, rl2, ratt2 = _ref_forward(params, inputs, masks, attn_masks, new_masks)
    np.testing.assert_allclose(np.asarray(value2), np.asarray(rv2), rtol=1e-4, atol=1e-4)
    np.testing.assert_allclose(np.asarray(actor2), np.asarray(ra2), rtol=1e-4, atol=1e-4)
    np.testing.assert_allclose(np.asarray(logp2), np.asarray(rl2), rtol=1e-4, atol=1e-4)
    np.testing.assert_allclose(np.asarray(attn_out2), np.asarray(ratt2), rtol=0, atol=0)

    assert value.shape == (batch, 1) and actor.shape == (batch, hidden_size)
    assert logp.shape == (batch, 1) and attn_out.shape == (batch, num_inputs)
    assert hxs.shape == rnn_hxs.shape

    print("KERNEL_OK")
</pallas_src>

<mosaic_0001>
module attributes {stable_mosaic.version = 11 : i64} {
  func.func @_fused_forward_kernel(%arg0: memref<8x16xf32, #tpu.memory_space<vmem>>, %arg1: memref<8x16xf32, #tpu.memory_space<vmem>>, %arg2: memref<8x16xf32, #tpu.memory_space<vmem>>, %arg3: memref<8x1xf32, #tpu.memory_space<vmem>>, %arg4: memref<1x16xf32, #tpu.memory_space<vmem>>, %arg5: memref<16x64xf32, #tpu.memory_space<vmem>>, %arg6: memref<1x64xf32, #tpu.memory_space<vmem>>, %arg7: memref<64x64xf32, #tpu.memory_space<vmem>>, %arg8: memref<1x64xf32, #tpu.memory_space<vmem>>, %arg9: memref<16x64xf32, #tpu.memory_space<vmem>>, %arg10: memref<1x64xf32, #tpu.memory_space<vmem>>, %arg11: memref<64x64xf32, #tpu.memory_space<vmem>>, %arg12: memref<1x64xf32, #tpu.memory_space<vmem>>, %arg13: memref<1x64xf32, #tpu.memory_space<vmem>>, %arg14: memref<1x1xf32, #tpu.memory_space<vmem>>, %arg15: memref<8x1xf32, #tpu.memory_space<vmem>>, %arg16: memref<8x64xf32, #tpu.memory_space<vmem>>, %arg17: memref<8x1xf32, #tpu.memory_space<vmem>>, %arg18: memref<8x16xf32, #tpu.memory_space<vmem>>) attributes {dimension_semantics = [], scalar_prefetch = 0 : i64, scratch_operands = 0 : i64, tpu.core_type = #tpu.core_type<tc>} {
    %c0 = arith.constant 0 : index
    %c0_0 = arith.constant 0 : index
    %0 = vector.load %arg3[%c0, %c0_0] : memref<8x1xf32, #tpu.memory_space<vmem>>, vector<8x1xf32>
    %c0_1 = arith.constant 0 : index
    %c0_2 = arith.constant 0 : index
    %1 = vector.load %arg2[%c0_1, %c0_2] : memref<8x16xf32, #tpu.memory_space<vmem>>, vector<8x16xf32>
    %cst = arith.constant 1.000000e+00 : f32
    %2 = vector.broadcast %cst : f32 to vector<8x1xf32>
    %3 = arith.subf %2, %0 : vector<8x1xf32>
    %4 = vector.broadcast %3 : vector<8x1xf32> to vector<8x16xf32>
    %5 = arith.mulf %1, %4 : vector<8x16xf32>
    %c0_3 = arith.constant 0 : index
    %c0_4 = arith.constant 0 : index
    %6 = vector.load %arg1[%c0_3, %c0_4] : memref<8x16xf32, #tpu.memory_space<vmem>>, vector<8x16xf32>
    %7 = vector.broadcast %0 : vector<8x1xf32> to vector<8x16xf32>
    %8 = arith.mulf %6, %7 : vector<8x16xf32>
    %9 = arith.addf %5, %8 : vector<8x16xf32>
    %c0_5 = arith.constant 0 : index
    %c0_6 = arith.constant 0 : index
    %10 = vector.load %arg18[%c0_5, %c0_6] : memref<8x16xf32, #tpu.memory_space<vmem>>, vector<8x16xf32>
    tpu.vector_store %arg18[%c0_5, %c0_6], %9 {strides = array<i32>} : memref<8x16xf32, #tpu.memory_space<vmem>>, vector<8x16xf32>,
    %c0_7 = arith.constant 0 : index
    %c0_8 = arith.constant 0 : index
    %11 = vector.load %arg4[%c0_7, %c0_8] : memref<1x16xf32, #tpu.memory_space<vmem>>, vector<1x16xf32>
    %cst_9 = arith.constant 0.000000e+00 : f32
    %12 = vector.broadcast %cst_9 : f32 to vector<1x16xf32>
    %13 = arith.maximumf %11, %12 : vector<1x16xf32>
    %14 = math.absf %11 : vector<1x16xf32>
    %cst_10 = arith.constant 0.000000e+00 : f32
    %15 = vector.broadcast %cst_10 : f32 to vector<1x16xf32>
    %16 = arith.subf %15, %14 : vector<1x16xf32>
    %17 = math.exp %16 : vector<1x16xf32>
    %cst_11 = arith.constant 1.000000e+00 : f32
    %18 = vector.broadcast %cst_11 : f32 to vector<1x16xf32>
    %19 = arith.addf %18, %17 : vector<1x16xf32>
    %20 = math.log %19 : vector<1x16xf32>
    %21 = arith.addf %13, %20 : vector<1x16xf32>
    %22 = vector.broadcast %11 : vector<1x16xf32> to vector<8x16xf32>
    %23 = arith.mulf %9, %22 : vector<8x16xf32>
    %24 = vector.broadcast %21 : vector<1x16xf32> to vector<8x16xf32>
    %25 = arith.subf %23, %24 : vector<8x16xf32>
    %cst_12 = arith.constant dense<0.000000e+00> : vector<8xf32>
    %26 = vector.multi_reduction <add>, %25, %cst_12 [1] : vector<8x16xf32> to vector<8xf32>
    %27 = vector.shape_cast %26 : vector<8xf32> to vector<8x1xf32>
    %c0_13 = arith.constant 0 : index
    %c0_14 = arith.constant 0 : index
    %28 = vector.load %arg17[%c0_13, %c0_14] : memref<8x1xf32, #tpu.memory_space<vmem>>, vector<8x1xf32>
    tpu.vector_store %arg17[%c0_13, %c0_14], %27 {strides = array<i32>} : memref<8x1xf32, #tpu.memory_space<vmem>>, vector<8x1xf32>,
    %c0_15 = arith.constant 0 : index
    %c0_16 = arith.constant 0 : index
    %29 = vector.load %arg0[%c0_15, %c0_16] : memref<8x16xf32, #tpu.memory_space<vmem>>, vector<8x16xf32>
    %30 = arith.mulf %9, %29 : vector<8x16xf32>
    %c0_17 = arith.constant 0 : index
    %c0_18 = arith.constant 0 : index
    %31 = vector.load %arg5[%c0_17, %c0_18] : memref<16x64xf32, #tpu.memory_space<vmem>>, vector<16x64xf32>
    %cst_19 = arith.constant dense<0.000000e+00> : vector<8x64xf32>
    %32 = tpu.matmul %30, %31, %cst_19 {dimension_numbers = #tpu.dot_dimension_numbers<[1], [0], [0], [1], [0, 0, 1, 1], [], []>} : vector<8x16xf32>, vector<16x64xf32>, vector<8x64xf32> -> vector<8x64xf32>
    %c0_20 = arith.constant 0 : index
    %c0_21 = arith.constant 0 : index
    %33 = vector.load %arg6[%c0_20, %c0_21] : memref<1x64xf32, #tpu.memory_space<vmem>>, vector<1x64xf32>
    %34 = vector.broadcast %33 : vector<1x64xf32> to vector<8x64xf32>
    %35 = arith.addf %32, %34 : vector<8x64xf32>
    %36 = math.tanh %35 : vector<8x64xf32>
    %c0_22 = arith.constant 0 : index
    %c0_23 = arith.constant 0 : index
    %37 = vector.load %arg7[%c0_22, %c0_23] : memref<64x64xf32, #tpu.memory_space<vmem>>, vector<64x64xf32>
    %cst_24 = arith.constant dense<0.000000e+00> : vector<8x64xf32>
    %38 = tpu.matmul %36, %37, %cst_24 {dimension_numbers = #tpu.dot_dimension_numbers<[1], [0], [0], [1], [0, 0, 1, 1], [], []>} : vector<8x64xf32>, vector<64x64xf32>, vector<8x64xf32> -> vector<8x64xf32>
    %c0_25 = arith.constant 0 : index
    %c0_26 = arith.constant 0 : index
    %39 = vector.load %arg8[%c0_25, %c0_26] : memref<1x64xf32, #tpu.memory_space<vmem>>, vector<1x64xf32>
    %40 = vector.broadcast %39 : vector<1x64xf32> to vector<8x64xf32>
    %41 = arith.addf %38, %40 : vector<8x64xf32>
    %42 = math.tanh %41 : vector<8x64xf32>
    %c0_27 = arith.constant 0 : index
    %c0_28 = arith.constant 0 : index
    %43 = vector.load %arg13[%c0_27, %c0_28] : memref<1x64xf32, #tpu.memory_space<vmem>>, vector<1x64xf32>
    %44 = vector.broadcast %43 : vector<1x64xf32> to vector<8x64xf32>
    %45 = arith.mulf %42, %44 : vector<8x64xf32>
    %cst_29 = arith.constant dense<0.000000e+00> : vector<8xf32>
    %46 = vector.multi_reduction <add>, %45, %cst_29 [1] : vector<8x64xf32> to vector<8xf32>
    %47 = vector.shape_cast %46 : vector<8xf32> to vector<8x1xf32>
    %c0_30 = arith.constant 0 : index
    %c0_31 = arith.constant 0 : index
    %48 = vector.load %arg14[%c0_30, %c0_31] : memref<1x1xf32, #tpu.memory_space<vmem>>, vector<1x1xf32>
    %49 = vector.broadcast %48 : vector<1x1xf32> to vector<8x1xf32>
    %50 = arith.addf %47, %49 : vector<8x1xf32>
    %c0_32 = arith.constant 0 : index
    %c0_33 = arith.constant 0 : index
    %51 = vector.load %arg15[%c0_32, %c0_33] : memref<8x1xf32, #tpu.memory_space<vmem>>, vector<8x1xf32>
    tpu.vector_store %arg15[%c0_32, %c0_33], %50 {strides = array<i32>} : memref<8x1xf32, #tpu.memory_space<vmem>>, vector<8x1xf32>,
    %c0_34 = arith.constant 0 : index
    %c0_35 = arith.constant 0 : index
    %52 = vector.load %arg9[%c0_34, %c0_35] : memref<16x64xf32, #tpu.memory_space<vmem>>, vector<16x64xf32>
    %cst_36 = arith.constant dense<0.000000e+00> : vector<8x64xf32>
    %53 = tpu.matmul %30, %52, %cst_36 {dimension_numbers = #tpu.dot_dimension_numbers<[1], [0], [0], [1], [0, 0, 1, 1], [], []>} : vector<8x16xf32>, vector<16x64xf32>, vector<8x64xf32> -> vector<8x64xf32>
    %c0_37 = arith.constant 0 : index
    %c0_38 = arith.constant 0 : index
    %54 = vector.load %arg10[%c0_37, %c0_38] : memref<1x64xf32, #tpu.memory_space<vmem>>, vector<1x64xf32>
    %55 = vector.broadcast %54 : vector<1x64xf32> to vector<8x64xf32>
    %56 = arith.addf %53, %55 : vector<8x64xf32>
    %57 = math.tanh %56 : vector<8x64xf32>
    %c0_39 = arith.constant 0 : index
    %c0_40 = arith.constant 0 : index
    %58 = vector.load %arg11[%c0_39, %c0_40] : memref<64x64xf32, #tpu.memory_space<vmem>>, vector<64x64xf32>
    %cst_41 = arith.constant dense<0.000000e+00> : vector<8x64xf32>
    %59 = tpu.matmul %57, %58, %cst_41 {dimension_numbers = #tpu.dot_dimension_numbers<[1], [0], [0], [1], [0, 0, 1, 1], [], []>} : vector<8x64xf32>, vector<64x64xf32>, vector<8x64xf32> -> vector<8x64xf32>
    %c0_42 = arith.constant 0 : index
    %c0_43 = arith.constant 0 : index
    %60 = vector.load %arg12[%c0_42, %c0_43] : memref<1x64xf32, #tpu.memory_space<vmem>>, vector<1x64xf32>
    %61 = vector.broadcast %60 : vector<1x64xf32> to vector<8x64xf32>
    %62 = arith.addf %59, %61 : vector<8x64xf32>
    %63 = math.tanh %62 : vector<8x64xf32>
    %c0_44 = arith.constant 0 : index
    %c0_45 = arith.constant 0 : index
    %64 = vector.load %arg16[%c0_44, %c0_45] : memref<8x64xf32, #tpu.memory_space<vmem>>, vector<8x64xf32>
    tpu.vector_store %arg16[%c0_44, %c0_45], %63 {strides = array<i32>} : memref<8x64xf32, #tpu.memory_space<vmem>>, vector<8x64xf32>,
    return
  }
}

</mosaic_0001>

<bundles_post_ra>
// kernel: tpu_custom_call.1
= control target key start
LH: loop header
LB: loop body
LE: loop exit
PB: predicated region body
PF: predicated region fallthrough
CT: control target
= control target key end

     0   :  { %s1083_s0 = inlined_call_operand.hbm [shape: f32[8,16], index: 0, kind: input, shape index: {}]   ;;  %s1084_s1 = inlined_call_operand.hbm [shape: f32[8,16], index: 1, kind: input, shape index: {}]   ;;  %s1085_s2 = inlined_call_operand.hbm [shape: f32[8,16], index: 2, kind: input, shape index: {}]   ;;  %s1086_s3 = inlined_call_operand.vmem [shape: f32[8,1], index: 3, kind: input, shape index: {}]   ;;  %s1087_s4 = inlined_call_operand.vmem [shape: f32[1,16], index: 4, kind: input, shape index: {}]   ;;  %s1088_s5 = inlined_call_operand.vmem [shape: f32[16,64], index: 5, kind: input, shape index: {}]   ;;  %s1089_s6 = inlined_call_operand.vmem [shape: f32[1,64], index: 6, kind: input, shape index: {}]   ;;  %s1090_s7 = inlined_call_operand.hbm [shape: f32[64,64], index: 7, kind: input, shape index: {}]   ;;  %s1091_s8 = inlined_call_operand.vmem [shape: f32[1,64], index: 8, kind: input, shape index: {}]   ;;  %s1092_s9 = inlined_call_operand.hbm [shape: f32[16,64], index: 9, kind: input, shape index: {}]   ;;  %s1093_s10 = inlined_call_operand.vmem [shape: f32[1,64], index: 10, kind: input, shape index: {}]   ;;  %s1094_s11 = inlined_call_operand.hbm [shape: f32[64,64], index: 11, kind: input, shape index: {}]   ;;  %s1095_s12 = inlined_call_operand.vmem [shape: f32[1,64], index: 12, kind: input, shape index: {}]   ;;  %s1096_s13 = inlined_call_operand.vmem [shape: f32[1,64], index: 13, kind: input, shape index: {}]   ;;  %s1097_s14 = inlined_call_operand.<no memory space> [shape: f32[1,1], index: 14, kind: input, shape index: {}]   ;;  %s1098_s15 = inlined_call_operand.vmem [shape: f32[8,1], index: 15, kind: output, shape index: {0}]   ;;  %s1099_s16 = inlined_call_operand.hbm [shape: f32[8,64], index: 16, kind: output, shape index: {1}]   ;;  %s1100_s17 = inlined_call_operand.vmem [shape: f32[8,1], index: 17, kind: output, shape index: {2}]   ;;  %s1101_s18 = inlined_call_operand.hbm [shape: f32[8,16], index: 18, kind: output, shape index: {3}]  }
   0x1   :  { %1102 = sst [smem:[#allocation23_spill]] %s1083_s0  ;;  %v24_v0 = vstv %s1097_s14 }
   0x2   :  { %1103 = sst [smem:[#allocation24_spill]] %s1084_s1  ;;  %25 = vst [vmem:[#allocation2] sm:$0x1] %v24_v0 }
   0x3   :  { %1104 = sst [smem:[#allocation25_spill]] %s1085_s2 }
   0x4   :  { %26 = vsyncpa [#allocation4], 0 }
   0x5   :  { %27 = vsyncpa [#allocation7], 0 }
   0x6   :  { %28 = vsyncpa [#allocation10], 0 }
   0x7   :  { %29 = vsyncpa [#allocation13], 0 }
   0x8   :  { %30 = vsyncpa [#allocation5], 0 }
   0x9   :  { %31 = vsyncpa [#allocation16], 0  ;;  %s871_s29 = smov [#allocation6]   ;;  %s872_s0 = smov [#allocation9]  }
   0xa   :  { %s48_s30 = sshll.u32 %s871_s29, 4  ;;  %s75_s19 = sshll.u32 %s872_s0, 4  ;;  %s49_s30 = int_to_ptr.vmem [resolvable:$true] %s48_s30  ;;  %s76_s19 = int_to_ptr.vmem [resolvable:$true] %s75_s19 }
   0xb   :  { %s707_s1 = scalar_lea.vmem %s49_s30, 128  ;;  %p712_p1 = scmp.lt.s32.totalorder %s49_s30, %s49_s30 }
   0xc   :  { %p708_p0 = scmp.ne.s32.totalorder %s49_s30, %s707_s1  ;;  %p713_p2 = scmp.lt.s32.totalorder %s707_s1, %s707_s1 }
   0xe   :  { %p714_p3 = por %p713_p2, %p712_p1 }
  0x10   :  { %p715_p4 = pnand %p714_p3, %p708_p0 }
  0x12   :  { %718 = shalt.err (!%p715_p4)
}
  0x13   :  { %s1105_s21 = sld [smem:[#allocation24_spill]]  ;;  %s727_s22 = scalar_lea.vmem %s76_s19, 1024 }
  0x14   :  { %p728_p5 = scmp.ne.s32.totalorder %s76_s19, %s727_s22  ;;  %p732_p6 = scmp.lt.s32.totalorder %s76_s19, %s76_s19 }
  0x15   :  { %p733_p7 = scmp.lt.s32.totalorder %s727_s22, %s727_s22 }
  0x17   :  { %p734_p8 = por %p733_p7, %p732_p6 }
  0x19   :  { %51 = dma.hbm_to_vmem [thread:$0]  %s1105_s21, 128, %s49_s30, [#allocation7]  }
  0x1a   :  { %p735_p9 = pnand %p734_p8, %p728_p5 }
  0x1c   :  { %738 = shalt.err (!%p735_p9)
}
  0x1d   :  { %s873_s2 = smov 128   ;;  %s874_s23 = smov 8  }
  0x1e   :  { %81 = dma.hbm_to_vmem [thread:$0]  %s1090_s7, 1024, %s76_s19, [#allocation10], %s873_s2, %s873_s2, %s874_s23  }
  0x1f   :  { %s875_s26 = smov [#allocation3]   ;;  %s876_s28 = smov [#allocation8]  }
  0x20   :  { %s38_s27 = sshll.u32 %s875_s26, 4  ;;  %s58_s29 = sshll.u32 %s876_s28, 4  ;;  %s39_s27 = int_to_ptr.vmem [resolvable:$true] %s38_s27  ;;  %s59_s29 = int_to_ptr.vmem [resolvable:$true] %s58_s29 }
  0x21   :  { %s747_s30 = scalar_lea.vmem %s39_s27, 128  ;;  %p752_p11 = scmp.lt.s32.totalorder %s39_s27, %s39_s27 }
  0x22   :  { %p748_p10 = scmp.ne.s32.totalorder %s39_s27, %s747_s30  ;;  %p753_p12 = scmp.lt.s32.totalorder %s747_s30, %s747_s30 }
  0x24   :  { %p754_p13 = por %p753_p12, %p752_p11 }
  0x26   :  { %p755_p0 = pnand %p754_p13, %p748_p10 }
  0x28   :  { %758 = shalt.err (!%p755_p0)
}
  0x29   :  { %s1106_s14 = sld [smem:[#allocation23_spill]]  ;;  %s767_s20 = scalar_lea.vmem %s59_s29, 128 }
  0x2a   :  { %p768_p1 = scmp.ne.s32.totalorder %s59_s29, %s767_s20  ;;  %p772_p2 = scmp.lt.s32.totalorder %s59_s29, %s59_s29 }
  0x2b   :  { %p773_p3 = scmp.lt.s32.totalorder %s767_s20, %s767_s20 }
  0x2d   :  { %p774_p4 = por %p773_p3, %p772_p2 }
  0x2f   :  { %41 = dma.hbm_to_vmem [thread:$0]  %s1106_s14, 128, %s39_s27, [#allocation4]  }
  0x30   :  { %p775_p5 = pnand %p774_p4, %p768_p1 }
  0x32   :  { %778 = shalt.err (!%p775_p5)
}
  0x33   :  { %s1107_s21 = sld [smem:[#allocation25_spill]]  ;;  %s877_s22 = smov [#allocation11]  }
  0x34   :  { %s89_s24 = sshll.u32 %s877_s22, 4  ;;  %s878_s25 = smov [#allocation12]   ;;  %s90_s24 = int_to_ptr.vmem [resolvable:$true] %s89_s24 }
  0x35   :  { %s103_s26 = sshll.u32 %s878_s25, 4  ;;  %s787_s28 = scalar_lea.vmem %s90_s24, 256  ;;  %s104_s26 = int_to_ptr.vmem [resolvable:$true] %s103_s26 }
  0x36   :  { %p788_p6 = scmp.ne.s32.totalorder %s90_s24, %s787_s28  ;;  %p792_p7 = scmp.lt.s32.totalorder %s90_s24, %s90_s24 }
  0x37   :  { %p793_p8 = scmp.lt.s32.totalorder %s787_s28, %s787_s28 }
  0x39   :  { %61 = dma.hbm_to_vmem [thread:$0]  %s1107_s21, 128, %s59_s29, [#allocation7]  }
  0x3a   :  { %p794_p9 = por %p793_p8, %p792_p7 }
  0x3c   :  { %p795_p10 = pnand %p794_p9, %p788_p6 }
  0x3e   :  { %798 = shalt.err (!%p795_p10)
}
  0x3f   :  { %95 = dma.hbm_to_vmem [thread:$0]  %s1092_s9, 256, %s90_s24, [#allocation10], %s873_s2, %s873_s2, %s874_s23  }
  0x40   :  { %s807_s29 = scalar_lea.vmem %s104_s26, 1024  ;;  %p812_p12 = scmp.lt.s32.totalorder %s104_s26, %s104_s26 }
  0x41   :  { %p808_p11 = scmp.ne.s32.totalorder %s104_s26, %s807_s29  ;;  %p813_p13 = scmp.lt.s32.totalorder %s807_s29, %s807_s29 }
  0x43   :  { %p814_p0 = por %p813_p13, %p812_p12 }
  0x45   :  { %p815_p1 = pnand %p814_p0, %p808_p11 }
  0x47   :  { %818 = shalt.err (!%p815_p1)
}
  0x48   :  { %109 = dma.hbm_to_vmem [thread:$0]  %s1094_s11, 1024, %s104_s26, [#allocation13], %s873_s2, %s873_s2, %s874_s23  }
  0x49   :  { %859 = dma.done.wait [#allocation4], 128  }
  0x4a   :  { %860 = vsyncadd [#allocation4], 4294967168 }
  0x4b   :  { %861 = dma.done.wait [#allocation7], 256  }
  0x4c   :  { %862 = vsyncadd [#allocation7], 4294967040 }
  0x4d   :  { %863 = dma.done.wait [#allocation10], 1280  }
  0x4e   :  { %864 = vsyncadd [#allocation10], 4294966016 }
  0x4f   :  { %865 = dma.done.wait [#allocation13], 1024  }
  0x50   :  { %866 = vsyncadd [#allocation13], 4294966272  ;;  %v879_v1 = vmov 0   ;;  %v134_v2 = vld [vmem:[%s1086_s3] sm:$0xff]  ;;  %v880_v4 = vmov 0.0   ;;  %v185_v5 = vld [vmem:[%s1088_s5 + $0x8] sm:$0xff]  ;;  %v164_v15 = vlaneseq }
  0x51   :  { %686 = vset.pattern.permute.xlu0 %v879_v1  ;;  %v136_v3 = vsub.f32 1.0, %v134_v2  ;;  %621 = vmatprep.subr.mxu1 %v880_v4  ;;  %v378_v6 = vld [vmem:[#allocation11 + $0x8] sm:$0xff]  ;;  %v377_v8 = vld [vmem:[#allocation11] sm:$0xff]  ;;  %vm881_vm0 = vmmov 0   ;;  %v135_v22 = vld [vmem:[#allocation8] sm:$0xff]  ;;  %vm151_vm1 = vcmask 130048  }
  0x52   :  { %647 = vmatprep.subr.mxu0 %v880_v4  ;;  %622 = vmatpush3.msra.mxu1 %v185_v5  ;;  %v184_v7 = vld [vmem:[%s1088_s5] sm:$0xff]  ;;  %v165_v17 = vshrl.u32 %v164_v15, 7  ;;  %v143_v23 = vld [vmem:[#allocation6] sm:$0xff]  ;;  %v274_v36 = vld [vmem:[#allocation9 + $0x38] sm:$0xff]  ;;  %vm282_vm2 = vcmask 523264   ;;  %s883_s28 = smov [#allocation15]  }
  0x53   :  { %139 = vperm.xlu0 %686, %v136_v3   ;;  %648 = vmatpush3.msra.mxu0 %v378_v6  ;;  %v153_v9 = vld [vmem:[%s1087_s4] sm:$0x1]  ;;  %v182_v29 = vld [vmem:[#allocation3] sm:$0xff]  ;;  %v273_v38 = vld [vmem:[#allocation9 + $0x30] sm:$0xff]  ;;  %s567_s27 = sshll.u32 %s883_s28, 4  ;;  %s568_s27 = int_to_ptr.vmem [resolvable:$true] %s567_s27 }
  0x54   :  { %623 = vmatprep.subr.mxu1 %v880_v4  ;;  %649 = vmatprep.subr.mxu0 %v880_v4  ;;  %v155_v10 = vand.u32 2147483647, %v153_v9  ;;  %v154_v18 = vmax.f32 %v153_v9, 0.0  ;;  %v166_v21 = vsub.s32 0, %v165_v17  ;;  %v464_v37 = vld [vmem:[#allocation12 + $0x38] sm:$0xff]  ;;  %v463_v39 = vld [vmem:[#allocation12 + $0x30] sm:$0xff] }
  0x55   :  { %624 = vmatpush3.msra.mxu1 %v184_v7  ;;  %625 = vmatprep.mubr.msk.f32.mxu1 %vm881_vm0, %v880_v4  ;;  %v272_v40 = vld [vmem:[#allocation9 + $0x28] sm:$0xff]  ;;  %v462_v41 = vld [vmem:[#allocation12 + $0x28] sm:$0xff]  ;;  %v271_v42 = vld [vmem:[#allocation9 + $0x20] sm:$0xff] }
  0x56   :  { %650 = vmatpush3.msra.mxu0 %v377_v8  ;;  %651 = vmatprep.mubr.msk.f32.mxu0 %vm881_vm0, %v880_v4  ;;  %v156_v11 = vsub.f32 0.0, %v155_v10  ;;  %v167_v28 = vrot.slane %v153_v9, %v166_v21  ;;  %v461_v43 = vld [vmem:[#allocation12 + $0x20] sm:$0xff]  ;;  %v270_v44 = vld [vmem:[#allocation9 + $0x18] sm:$0xff]  ;;  %v460_v45 = vld [vmem:[#allocation12 + $0x18] sm:$0xff] }
  0x57   :  { %146 = vperm.xlu0 %686, %v134_v2   ;;  %628 = vmatprep.subr.mxu1 %v880_v4  ;;  %v269_v46 = vld [vmem:[#allocation9 + $0x10] sm:$0xff]  ;;  %v459_v47 = vld [vmem:[#allocation12 + $0x10] sm:$0xff]  ;;  %v268_v48 = vld [vmem:[#allocation9 + $0x8] sm:$0xff] }
  0x58   :  { %654 = vmatprep.subr.mxu0 %v880_v4  ;;  %v157_v12 = vmul.f32 1.442695, %v156_v11  ;;  %v458_v49 = vld [vmem:[#allocation12 + $0x8] sm:$0xff]  ;;  %v267_v50 = vld [vmem:[#allocation9] sm:$0xff]  ;;  %v457_v51 = vld [vmem:[#allocation12] sm:$0xff] }
  0x59   :  { %v587_v52 = vld [vmem:[%s1089_s6] ss:$0 sm:$0xff] }
  0x5a   :  { %687 = vpow2.f32 %v157_v12  ;;  %v593_v53 = vld [vmem:[%s1093_s10] ss:$0 sm:$0xff] }
  0x5b   :  { %v589_v62 = vld [vmem:[%s1091_s8] ss:$0 sm:$0xff]  ;;  %s882_s8 = smov [#allocation14]  }
  0x5c   :  { %v595_v63 = vld [vmem:[%s1095_s12] ss:$0 sm:$0xff]  ;;  %s555_s12 = sshll.u32 %s882_s8, 4  ;;  %s556_s12 = int_to_ptr.vmem [resolvable:$true] %s555_s12 }
  0x5d   :  { %v591_v6 = vld [vmem:[%s1096_s13] ss:$0 sm:$0xff]  ;;  %s819_s30 = scalar_lea.vmem %s556_s12, 128  ;;  %p824_p3 = scmp.lt.s32.totalorder %s556_s12, %s556_s12 }
  0x5e   :  { %p820_p2 = scmp.ne.s32.totalorder %s556_s12, %s819_s30  ;;  %p825_p4 = scmp.lt.s32.totalorder %s819_s30, %s819_s30 }
  0x60   :  { %p826_p5 = por %p825_p4, %p824_p3 }
  0x62   :  { %p827_p6 = pnand %p826_p5, %p820_p2 }
  0x67   :  { %v688_v13 = vpop.eup %687 }
  0x68   :  { %v159_v14 = vadd.f32 1.0, %v688_v13 }
  0x6a   :  { %689 = vlog2.f32 %v159_v14 }
  0x77   :  { %v690_v16 = vpop.eup %689 }
  0x78   :  { %v161_v19 = vmul.f32 0.6931472, %v690_v16 }
  0x7a   :  { %v162_v24 = vadd.f32 %v161_v19, %v154_v18 }
  0x7c   :  { %v174_v31 = vrot.slane %v162_v24, %v166_v21 }
  0xce   :  { %v140_v20 = vpop.permute.xlu0 %139 }
  0xcf   :  { %v142_v26 = vmul.f32 %v140_v20, %v135_v22 }
  0xd2   :  { %v147_v25 = vpop.permute.xlu0 %146 }
  0xd3   :  { %v149_v27 = vmul.f32 %v147_v25, %v143_v23 }
  0xd5   :  { %v150_v30 = vadd.f32 %v149_v27, %v142_v26 }
  0xd7   :  { %v183_v32 = vmul.f32 %v182_v29, %v150_v30  ;;  %152 = vst.msk [vmem:[#allocation15] sm:$0xff] %vm151_vm1, %v150_v30  ;;  %v169_v33 = vmul.f32 %v167_v28, %v150_v30 }
  0xd9   :  { %626 = vmatmul.mubr.msk.f32.vlgmr.msra.gmra.mxu1 %vm151_vm1, %v183_v32  ;;  %652 = vmatmul.mubr.msk.f32.vlgmr.msra.gmra.mxu0 %vm151_vm1, %v183_v32  ;;  %v176_v34 = vsub.f32 %v169_v33, %v174_v31 }
  0xda   :  { %644 = vmatprep.mubr.msk.f32.mxu1 %vm881_vm0, %v880_v4  ;;  %670 = vmatprep.mubr.msk.f32.mxu0 %vm881_vm0, %v880_v4 }
  0xdb   :  { %v1035_v35 = vsel %vm151_vm1, %v176_v34, 0.0  ;;  %629 = vmatpush3.msra.mxu1 %v274_v36  ;;  %655 = vmatpush3.msra.mxu0 %v464_v37 }
  0xdc   :  { %630 = vmatprep.subr.mxu1 %v880_v4  ;;  %656 = vmatprep.subr.mxu0 %v880_v4 }
  0xdd   :  { %631 = vmatpush3.msra.mxu1 %v273_v38  ;;  %657 = vmatpush3.msra.mxu0 %v463_v39 }
  0xde   :  { %632 = vmatprep.subr.mxu1 %v880_v4  ;;  %658 = vmatprep.subr.mxu0 %v880_v4 }
  0xdf   :  { %633 = vmatpush3.msra.mxu1 %v272_v40  ;;  %659 = vmatpush3.msra.mxu0 %v462_v41 }
  0xe0   :  { %634 = vmatprep.subr.mxu1 %v880_v4  ;;  %660 = vmatprep.subr.mxu0 %v880_v4 }
  0xe1   :  { %635 = vmatpush3.msra.mxu1 %v271_v42  ;;  %661 = vmatpush3.msra.mxu0 %v461_v43 }
  0xe2   :  { %636 = vmatprep.subr.mxu1 %v880_v4  ;;  %662 = vmatprep.subr.mxu0 %v880_v4 }
  0xe3   :  { %637 = vmatpush3.msra.mxu1 %v270_v44  ;;  %663 = vmatpush3.msra.mxu0 %v460_v45 }
  0xe4   :  { %638 = vmatprep.subr.mxu1 %v880_v4  ;;  %664 = vmatprep.subr.mxu0 %v880_v4 }
  0xe5   :  { %639 = vmatpush3.msra.mxu1 %v269_v46  ;;  %665 = vmatpush3.msra.mxu0 %v459_v47 }
  0xe6   :  { %640 = vmatprep.subr.mxu1 %v880_v4  ;;  %666 = vmatprep.subr.mxu0 %v880_v4 }
  0xe7   :  { %641 = vmatpush3.msra.mxu1 %v268_v48  ;;  %667 = vmatpush3.msra.mxu0 %v458_v49 }
  0xe8   :  { %642 = vmatprep.subr.mxu1 %v880_v4  ;;  %668 = vmatprep.subr.mxu0 %v880_v4 }
  0xe9   :  { %643 = vmatpush3.msra.mxu1 %v267_v50  ;;  %669 = vmatpush3.msra.mxu0 %v457_v51 }
 0x199   :  { %v262_v54 = vpop.f32.mrf.mxu1  ;;  %v452_v55 = vpop.f32.mrf.mxu0 }
 0x19a   :  { %v263_v56 = vadd.f32 %v587_v52, %v262_v54  ;;  %v453_v57 = vadd.f32 %v593_v53, %v452_v55 }
 0x19b   :  { %v627_v58 = vpop.f32.mrf.mxu1  ;;  %v653_v59 = vpop.f32.mrf.mxu0 }
 0x19c   :  { %691 = vtanh.f32 %v263_v56 }
 0x19d   :  { %693 = vtanh.f32 %v453_v57 }
 0x1a9   :  { %v692_v60 = vpop.eup %691 }
 0x1aa   :  { %v694_v61 = vpop.eup %693  ;;  %645 = vmatmul.mubr.msk.f32.vlgmr.msra.gmra.mxu1 %vm282_vm2, %v692_v60 }
 0x1ab   :  { %671 = vmatmul.mubr.msk.f32.vlgmr.msra.gmra.mxu0 %vm282_vm2, %v694_v61 }
 0x26a   :  { %v352_v0 = vpop.f32.mrf.mxu1 }
 0x26b   :  { %v353_v1 = vadd.f32 %v589_v62, %v352_v0  ;;  %v541_v2 = vpop.f32.mrf.mxu0 }
 0x26c   :  { %v542_v3 = vadd.f32 %v595_v63, %v541_v2  ;;  %v646_v4 = vpop.f32.mrf.mxu1 }
 0x26d   :  { %695 = vtanh.f32 %v353_v1  ;;  %v672_v5 = vpop.f32.mrf.mxu0 }
 0x26e   :  { %697 = vtanh.f32 %v542_v3 }
 0x27a   :  { %v696_v7 = vpop.eup %695 }
 0x27b   :  { %v698_v8 = vpop.eup %697  ;;  %v364_v9 = vmul.f32 %v696_v7, %v591_v6 }
 0x27c   :  { %546 = vst.msk [vmem:[#allocation14] sm:$0xff] %vm282_vm2, %v698_v8 }
 0x27d   :  { %v365_v10 = vsel %vm282_vm2, %v364_v9, 0.0 }
 0x27e   :  { %366 = vadd.xlane.f32.xlu1 %v365_v10 }
 0x282   :  { %178 = vadd.xlane.f32.xlu1 %v1035_v35 }
 0x283   :  { %830 = shalt.err (!%p827_p6)
}
 0x284   :  { %558 = dma.vmem_to_hbm [thread:$0]  %s556_s12, 128, %s1099_s16, [#allocation5]  }
 0x285   :  { %s839_s0 = scalar_lea.vmem %s568_s27, 128  ;;  %p844_p8 = scmp.lt.s32.totalorder %s568_s27, %s568_s27 }
 0x286   :  { %p840_p7 = scmp.ne.s32.totalorder %s568_s27, %s839_s0  ;;  %p845_p9 = scmp.lt.s32.totalorder %s839_s0, %s839_s0 }
 0x288   :  { %p846_p10 = por %p845_p9, %p844_p8 }
 0x28a   :  { %p847_p11 = pnand %p846_p10, %p840_p7 }
 0x28c   :  { %850 = shalt.err (!%p847_p11)
}
 0x28d   :  { %570 = dma.vmem_to_hbm [thread:$0]  %s568_s27, 128, %s1101_s18, [#allocation16]   ;;  %v592_v11 = vld [vmem:[#allocation2] ss:$0 sm:$0xff]  ;;  %vm180_vm3 = vcmask 7168  }
 0x307   :  { %v367_v12 = vpop.xlane.xlu1 %366 }
 0x308   :  { %v375_v13 = vadd.f32 %v592_v11, %v367_v12 }
 0x30a   :  { %376 = vst.msk [vmem:[%s1098_s15] sm:$0xff] %vm180_vm3, %v375_v13 }
 0x30b   :  { %v179_v14 = vpop.xlane.xlu1 %178 }
 0x30c   :  { %181 = vst.msk [vmem:[%s1100_s17] sm:$0xff] %vm180_vm3, %v179_v14 }
 0x30d   :  { %867 = dma.done.wait [#allocation5], 128  }
 0x30e   :  { %868 = vsyncadd [#allocation5], 4294967168 }
 0x30f   :  { %869 = dma.done.wait [#allocation16], 128  }
 0x310   :  { %870 = vsyncadd [#allocation16], 4294967168 }
 0x311   :  { %581 = vsyncpa [#allocation4], 1 }
 0x312   :  { %582 = vsyncpa [#allocation7], 1 }
 0x313   :  { %583 = vsyncpa [#allocation10], 1 }
 0x314   :  { %584 = vsyncpa [#allocation13], 1 }
 0x315   :  { %585 = vsyncpa [#allocation5], 1 }
 0x316   :  { %586 = vsyncpa [#allocation16], 1 }

</bundles_post_ra>
